<compile_context>
chip_gen: v7x
topology: tpu7x:2x2x1
jax: 0.10.0
libtpu: 0.0.40
codegen_flags: <defaults>
</compile_context>

<pallas_src>
import functools

import jax
import jax.numpy as jnp
from jax import lax
from jax.experimental import pallas as pl
from jax.experimental.pallas import tpu as pltpu


def _patch_embed_kernel(x_ref, w_ref, b_ref, o_ref):
    # x_ref: (C, TS)   w_ref: (C, E)   b_ref: (1, E)   o_ref: (TS, E)
    lhs = x_ref[...].astype(w_ref.dtype)              # no-op unless mxu_dtype set
    acc = lax.dot_general(
        lhs, w_ref[...],
        dimension_numbers=(((0,), (0,)), ((), ())),   # contract over C
        preferred_element_type=jnp.float32,           # f32 MXU accumulate
    )                                                  # -> (TS, E) f32
    o_ref[...] = (acc + b_ref[...]).astype(o_ref.dtype)


@functools.partial(jax.jit, static_argnames=("ts", "out_dtype", "mxu_dtype"))
def patch_embed_1d(x, weight, bias, *, ts=2048, out_dtype=None, mxu_dtype=None):
    """Pointwise Conv1d + rearrange('b c s -> b s c').

    x: (B, C, S), weight: (E, C, 1), bias: (E,)  ->  (B, S, E)

    out_dtype: output dtype (default: x.dtype). Pass jnp.bfloat16 in a real
               model to halve the dominant output HBM write.
    mxu_dtype: matmul operand dtype (default: x.dtype). Pass jnp.bfloat16 on
               v5e to keep its bf16-native MXU off the critical path.
    """
    B, C, S = x.shape
    E = weight.shape[0]
    out_dtype = x.dtype if out_dtype is None else jnp.dtype(out_dtype)
    op_dtype = x.dtype if mxu_dtype is None else jnp.dtype(mxu_dtype)

    # --- parameter prep (tiny, param-sized, plain JAX) ------------------------
    w = jnp.transpose(weight.reshape(E, C), (1, 0)).astype(op_dtype)   # (C, E)
    b2 = bias.astype(jnp.float32).reshape(1, E)                        # (1, E)

    # --- spatial tiling (no padding, no trailing slice) ------------------------
    ts = min(ts, S)
    if ts < S and ts % 128 != 0:
        # Non-full blocks must keep the lane dim a multiple of 128.
        ts = max(128, (ts // 128) * 128)
    n_s = pl.cdiv(S, ts)   # ragged last tile handled by Pallas partial-block clip

    cost = pl.CostEstimate(
        flops=2 * B * S * C * E,
        transcendentals=0,
        bytes_accessed=(x.size * x.dtype.itemsize
                        + w.size * w.dtype.itemsize
                        + b2.size * b2.dtype.itemsize
                        + B * S * E * out_dtype.itemsize),
    )

    return pl.pallas_call(
        _patch_embed_kernel,
        out_shape=jax.ShapeDtypeStruct((B, S, E), out_dtype),
        grid_spec=pl.GridSpec(
            # Long spatial axis first so v7x megacore shards it across both TCs
            # even when B == 1; both axes are independent ("parallel").
            grid=(n_s, B),
            in_specs=[
                # x tile from native (B, C, S) layout: lane-dense along S.
                pl.BlockSpec((pl.Squeezed(), C, ts), lambda si, bi: (bi, 0, si)),
                # W and bias: constant block index -> resident in VMEM.
                pl.BlockSpec((C, E), lambda si, bi: (0, 0)),
                pl.BlockSpec((1, E), lambda si, bi: (0, 0)),
            ],
            out_specs=pl.BlockSpec(
                (pl.Squeezed(), ts, E), lambda si, bi: (bi, si, 0)
            ),
        ),
        compiler_params=pltpu.CompilerParams(
            dimension_semantics=("parallel", "parallel"),
        ),
        cost_estimate=cost,
    )(x, w, b2)


if __name__ == "__main__":
    key = jax.random.PRNGKey(0)

    def ref_fn(x, weight, bias):
        E, C = weight.shape[0], weight.shape[1]
        return jnp.einsum("bcs,ec->bse", x, weight.reshape(E, C)) + bias[None, None, :]

    # 1) Small shapes consistent with the module's forward: B=2, C=4, S=16, E=32.
    B, C, S, E = 2, 4, 16, 32
    kx, kw, kb = jax.random.split(key, 3)
    x = jax.random.normal(kx, (B, C, S), dtype=jnp.float32)
    weight = jax.random.normal(kw, (E, C, 1), dtype=jnp.float32) * 0.02   # (E, C, 1)
    bias = jax.random.normal(kb, (E,), dtype=jnp.float32) * 0.02          # (E,)

    out = jax.block_until_ready(patch_embed_1d(x, weight, bias))
    assert out.shape == (B, S, E)
    assert out.dtype == x.dtype
    assert jnp.allclose(out, ref_fn(x, weight, bias), atol=1e-5, rtol=1e-5)

    # 2) Non-divisible S: exercises the partial-last-block path (no pad/slice).
    B2, C2, S2, E2 = 1, 4, 300, 256
    kx2, kw2, kb2 = jax.random.split(jax.random.fold_in(key, 1), 3)
    x2 = jax.random.normal(kx2, (B2, C2, S2), dtype=jnp.float32)
    w2 = jax.random.normal(kw2, (E2, C2, 1), dtype=jnp.float32) * 0.02
    b2 = jax.random.normal(kb2, (E2,), dtype=jnp.float32) * 0.02

    out2 = jax.block_until_ready(patch_embed_1d(x2, w2, b2, ts=128))
    assert out2.shape == (B2, S2, E2)
    assert jnp.allclose(out2, ref_fn(x2, w2, b2), atol=1e-5, rtol=1e-5)

    print("KERNEL_OK")
</pallas_src>

<mosaic_0001>
module attributes {stable_mosaic.version = 11 : i64} {
  func.func @_patch_embed_kernel(%arg0: i32, %arg1: i32, %arg2: memref<1x4x16xf32, #tpu.memory_space<vmem>>, %arg3: memref<4x32xf32, #tpu.memory_space<vmem>>, %arg4: memref<1x32xf32, #tpu.memory_space<vmem>>, %arg5: memref<1x16x32xf32, #tpu.memory_space<vmem>>) attributes {dimension_semantics = [#tpu.dimension_semantics<parallel>, #tpu.dimension_semantics<parallel>], iteration_bounds = array<i64: 1, 2>, scalar_prefetch = 0 : i64, scratch_operands = 0 : i64, tpu.core_type = #tpu.core_type<tc>, window_params = [{transform_indices = @transform_0, window_bounds = array<i64: 1, 4, 16>}, {pipeline_mode = #tpu.pipeline_mode<synchronous>, transform_indices = @transform_1, window_bounds = array<i64: 4, 32>}, {pipeline_mode = #tpu.pipeline_mode<synchronous>, transform_indices = @transform_2, window_bounds = array<i64: 1, 32>}, {transform_indices = @transform_3, window_bounds = array<i64: 1, 16, 32>}]} {
    %c0 = arith.constant 0 : index
    %c0_0 = arith.constant 0 : index
    %c0_1 = arith.constant 0 : index
    %0 = vector.load %arg2[%c0, %c0_0, %c0_1] : memref<1x4x16xf32, #tpu.memory_space<vmem>>, vector<1x4x16xf32>
    %1 = vector.shape_cast %0 : vector<1x4x16xf32> to vector<4x16xf32>
    %c0_2 = arith.constant 0 : index
    %c0_3 = arith.constant 0 : index
    %2 = vector.load %arg3[%c0_2, %c0_3] : memref<4x32xf32, #tpu.memory_space<vmem>>, vector<4x32xf32>
    %cst = arith.constant dense<0.000000e+00> : vector<16x32xf32>
    %3 = tpu.matmul %1, %2, %cst {dimension_numbers = #tpu.dot_dimension_numbers<[0], [0], [1], [1], [0, 1, 1, 1], [], []>} : vector<4x16xf32>, vector<4x32xf32>, vector<16x32xf32> -> vector<16x32xf32>
    %c0_4 = arith.constant 0 : index
    %c0_5 = arith.constant 0 : index
    %4 = vector.load %arg4[%c0_4, %c0_5] : memref<1x32xf32, #tpu.memory_space<vmem>>, vector<1x32xf32>
    %5 = vector.broadcast %4 : vector<1x32xf32> to vector<16x32xf32>
    %6 = arith.addf %3, %5 : vector<16x32xf32>
    %c0_6 = arith.constant 0 : index
    %c0_7 = arith.constant 0 : index
    %c0_8 = arith.constant 0 : index
    %7 = vector.load %arg5[%c0_6, %c0_7, %c0_8] : memref<1x16x32xf32, #tpu.memory_space<vmem>>, vector<1x16x32xf32>
    %8 = vector.shape_cast %7 : vector<1x16x32xf32> to vector<16x32xf32>
    %9 = vector.shape_cast %6 : vector<16x32xf32> to vector<1x16x32xf32>
    tpu.vector_store %arg5[%c0_6, %c0_7, %c0_8], %9 {strides = array<i32>} : memref<1x16x32xf32, #tpu.memory_space<vmem>>, vector<1x16x32xf32>,
    return
  }
  func.func @transform_0(%arg0: i32, %arg1: i32) -> (i32, i32, i32) {
    %c0_i32 = arith.constant 0 : i32
    %c0_i32_0 = arith.constant 0 : i32
    return %arg1, %c0_i32, %arg0 : i32, i32, i32
  }
  func.func @transform_1(%arg0: i32, %arg1: i32) -> (i32, i32) {
    %c0_i32 = arith.constant 0 : i32
    %c0_i32_0 = arith.constant 0 : i32
    %c0_i32_1 = arith.constant 0 : i32
    return %c0_i32, %c0_i32_0 : i32, i32
  }
  func.func @transform_2(%arg0: i32, %arg1: i32) -> (i32, i32) {
    %c0_i32 = arith.constant 0 : i32
    %c0_i32_0 = arith.constant 0 : i32
    %c0_i32_1 = arith.constant 0 : i32
    return %c0_i32, %c0_i32_0 : i32, i32
  }
  func.func @transform_3(%arg0: i32, %arg1: i32) -> (i32, i32, i32) {
    %c0_i32 = arith.constant 0 : i32
    %c0_i32_0 = arith.constant 0 : i32
    return %arg1, %arg0, %c0_i32 : i32, i32, i32
  }
}

</mosaic_0001>

<bundles_post_ra>
// kernel: patch_embed_1d.1
= control target key start
LH: loop header
LB: loop body
LE: loop exit
PB: predicated region body
PF: predicated region fallthrough
CT: control target
= control target key end

     0   :  { %8 = vsyncpa [#allocation3], 0  ;;  %s846_s0 = inlined_call_operand.hbm [shape: f32[2,4,16], index: 0, kind: input, shape index: {}]   ;;  %s847_s1 = inlined_call_operand.vmem [shape: f32[4,32], index: 1, kind: input, shape index: {}]   ;;  %s848_s2 = inlined_call_operand.vmem [shape: f32[1,32], index: 2, kind: input, shape index: {}]   ;;  %s849_s3 = inlined_call_operand.hbm [shape: f32[2,16,32], index: 3, kind: output, shape index: {}]  }
   0x1   :  { %10 = vsyncpa [#allocation3 + $0x1], 0 }
   0x2   :  { %11 = vsyncpa [#allocation4], 0 }
   0x3   :  { %13 = vsyncpa [#allocation4 + $0x1], 0  ;;  %s665_s12 = smov 0   ;;  %s667_s13 = smov 0  }
   0x4   :  { %s669_s14 = smov 0   ;;  %s671_s15 = smov 0  }
   0x5   :  { %s673_s16 = smov 0   ;;  %s675_s17 = smov 0  }
   0x6 LB: > { %s435_s18 = sadd.s32 4294967295, %s639_s17   ;;  %s436_s19 = sadd.s32 4294967294, %s639_s17   ;;  %s639_s17 = sphi %s675_s17, %s19_s17   ;;  %s635_s16 = sphi %s673_s16, %s865_s16   ;;  %s631_s15 = sphi %s671_s15, %s864_s15   ;;  %s627_s14 = sphi %s669_s14, %s863_s14   ;;  %s623_s13 = sphi %s667_s13, %s862_s13   ;;  %s619_s12 = sphi %s665_s12, %s861_s12  }
   0x7   : > { %s28_s20 = sadd.s32 1, %s635_s16  ;;  %s40_s21 = sadd.s32 1, %s627_s14 }
   0x8   : > { %p29_p0 = scmp.ge.s32.totalorder %s28_s20, 2  ;;  %p47_p1 = scmp.ne.s32.totalorder %s627_s14, %s623_s13 }
   0x9   : > { %p48_p2 = scmp.eq.s32.totalorder %s639_s17, 0  ;;  %p53_p3 = scmp.ne.s32.totalorder %s623_s13, %s619_s12 }
   0xa   : > { %s867_s20 = smov (%p29_p0, %s28_s20), 0  ;;  %p54_p5 = scmp.eq.s32.totalorder %s435_s18, 0 }
   0xb   : > { %p706_p4 = por %p48_p2, %p47_p1  ;;  %s35_s23 = ssub.s32 %s635_s16, %s867_s20 }
   0xc   : > { %p121_p6 = scmp.eq.s32.totalorder %s435_s18, 1  ;;  %p38_p7 = scmp.eq.s32.totalorder %s35_s23, 0 }
   0xd   : > { %p712_p8 = por %p54_p5, %p53_p3  ;;  %p127_p10 = scmp.eq.s32.totalorder %s436_s19, 1 }
   0xe   : > { %p716_p9 = por %p121_p6, %p47_p1  ;;  %p474_p13 = scmp.lt.s32.totalorder %s639_s17, 2 }
   0xf   : > { %s721_s26 = scalar_select %p38_p7, %s627_s14, %s40_s21  }
  0x10   : > { %s853_s25 = scalar_select %p716_p9, 1, 0 }
  0x11   : > { %p723_p11 = por %p127_p10, %p53_p3  ;;  %s153_s28 = sand.u32 1, %s627_s14  }
  0x12   : > { %s439_s29 = sshll.u32 %s153_s28, 2  ;;  %s440_s30 = sshll.u32 %s635_s16, 6 }
  0x13   : > { %s854_s27 = scalar_select %p723_p11, 1, 0 }
  0x14   : > { %s734_s6 = scalar_lea.hbm %s846_s0, %s440_s30  ;;  %s157_s7 = scalar_lea.vmem [#allocation2], %s439_s29 }
  0x15   : > { %s165_s8 = sshll.u32 %s157_s7, 4  ;;  %p740_p0 = pnand %p474_p13, %p706_p4  ;;  %s736_s8 = int_to_ptr.vmem [resolvable:$true] %s165_s8 }
  0x16   : > { %s154_s10 = scalar_lea.sflag [#allocation3], %s153_s28  ;;  %s527_s11 = scalar_lea.hbm %s734_s6, 64 }
  0x17   : > { %p528_p3 = scmp.ne.s32.totalorder %s734_s6, %s527_s11  ;;  %p529_p5 = pneg %p740_p0 }
  0x18   : > { %s532_s21 = scalar_lea.hbm %s846_s0, 128  ;;  %p533_p4 = scmp.lt.u32.totalorder %s734_s6, %s846_s0 }
  0x19   : > { %p530_p6 = pnand %p529_p5, %p528_p3  ;;  %p534_p10 = scmp.lt.u32.totalorder %s532_s21, %s527_s11 }
  0x1a   : > { %p536_p12 = scmp.lt.u32.totalorder %s527_s11, %s734_s6 }
  0x1b   : > { %p531_p7 = pneg %p530_p6  ;;  %p535_p13 = por %p534_p10, %p533_p4 }
  0x1d   : > { %p537_p1 = por %p536_p12, %p535_p13 }
  0x1f   : > { %p538_p2 = pnand %p537_p1, %p531_p7 }
  0x21   : > { %541 = shalt.err (!%p538_p2)
}
  0x22   : > { %s542_s28 = scalar_lea.vmem %s736_s8, 64  ;;  %s641_s29 = smov [#allocation2]  }
  0x23   : > { %p543_p3 = scmp.ne.s32.totalorder %s736_s8, %s542_s28  ;;  %s547_s30 = sshll.u32 %s641_s29, 4  ;;  %s548_s30 = int_to_ptr.vmem [resolvable:$false] %s547_s30 }
  0x24   : > { %s549_s4 = scalar_lea.vmem %s548_s30, 128  ;;  %p550_p9 = scmp.lt.s32.totalorder %s736_s8, %s548_s30 }
  0x25   : > { %p545_p6 = pnand %p543_p3, %p529_p5  ;;  %p551_p4 = scmp.lt.s32.totalorder %s549_s4, %s542_s28 }
  0x27   : > { %p546_p11 = pneg %p545_p6  ;;  %p552_p10 = por %p551_p4, %p550_p9 }
  0x29   : > { %p553_p12 = pnand %p552_p10, %p546_p11 }
  0x2b   : > { %556 = shalt.err (!%p553_p12)
}
  0x2c   : > { %469 = dma.hbm_to_vmem [thread:$0]  (!%p740_p0), %s734_s6, 64, %s736_s8, %s154_s10  }
  0x2d   : > { %p856_p1 = scmp.lt.s32.totalorder %s639_s17, 3  ;;  %p857_p2 = scmp.ge.s32.totalorder %s639_s17, 1 }
  0x2f   : > { %p171_p5 = pnand %p857_p2, %p856_p1 }
  0x30   : > { %s776_s5 = sand.u32 (!%p171_p5), 1, %s623_s13  }
  0x31   : > { %174 = sbr.rel (%p171_p5) target bundleno = 421 (0x1a5), region = 32  ;;  %s442_s7 = sshll.u32 (!%p171_p5), %s776_s5, 2 }
  0x32   : > { %s177_s11 = scalar_lea.sflag (!%p171_p5), [#allocation3], %s776_s5  ;;  %s180_s18 = scalar_lea.vmem (!%p171_p5), [#allocation2], %s442_s7 }
  0x38   : > { %610 = dma.done.wait (%p712_p8), %s177_s11, 64  }
  0x39   : > { %612 = vsyncadd (%p712_p8), %s177_s11, 4294967232  ;;  %v204_v0 = vld [vmem:[%s180_s18] sm:$0xf]  ;;  %vm252_vm0 = vcmask 1043456   ;;  %vm245_vm1 = vcmask 31744   ;;  %s443_s9 = sshll.u32 %s776_s5, 4 }
  0x3a   : > { %213 = vxpose.xlu0.b32.start.end [1/1] (short) (narrow) %v204_v0, 16  ;;  %v205_v1 = vld [vmem:[%s847_s1] sm:$0xf]  ;;  %s202_s24 = scalar_lea.vmem [#allocation5], %s443_s9  ;;  %s453_s22 = sshll.u32 %s631_s15, 8  ;;  %vm331_vm2 = vcmask 261120  }
  0x3b   : > { %457 = vmatprep.subr.msk.mxu0 %vm252_vm0, %v205_v1  ;;  %s350_s10 = sshll.u32 %s202_s24, 4  ;;  %v444_v4 = vld [vmem:[%s848_s2] ss:$0 sm:$0xff]  ;;  %s797_s29 = scalar_lea.hbm %s849_s3, %s453_s22  ;;  %s792_s10 = int_to_ptr.vmem [resolvable:$true] %s350_s10 }
  0x3c   : > { %458 = vmatpush3.msk.msra.mxu0 %vm252_vm0, %v205_v1  ;;  %s335_s30 = scalar_lea.sflag [#allocation4], %s776_s5  ;;  %s557_s4 = scalar_lea.vmem %s792_s10, 256 }
  0x3d   : > { %p558_p8 = scmp.ne.s32.totalorder %s792_s10, %s557_s4  ;;  %p858_p9 = scmp.ne.s32.totalorder %s853_s25, 0 }
  0x3e   : > { %s642_s15 = smov [#allocation5]  }
  0x3f   : > { %p559_p11 = pnand %p558_p8, %p858_p9  ;;  %s561_s7 = sshll.u32 %s642_s15, 4  ;;  %s562_s7 = int_to_ptr.vmem [resolvable:$false] %s561_s7 }
  0x40   : > { %s563_s11 = scalar_lea.vmem %s562_s7, 512  ;;  %p564_p7 = scmp.lt.s32.totalorder %s792_s10, %s562_s7 }
  0x41   : > { %p560_p0 = pneg %p559_p11  ;;  %p565_p13 = scmp.lt.s32.totalorder %s563_s11, %s557_s4 }
  0x43   : > { %p566_p3 = por %p565_p13, %p564_p7 }
  0x45   : > { %p567_p6 = pnand %p566_p3, %p560_p0 }
  0xba   : > { %v229_v2 = vpop.trf.xlu0 }
  0xbb   : > { %459 = vmatprep.mubr.msk.f32.mxu0 %vm245_vm1, %v229_v2 }
  0xbe   : > { %v230_v3 = vpop.trf.xlu0 }
  0xbf   : > { %460 = vmatmul.mubr.msk.f32.vlgmr.msra.gmra.mrb[0].mxu0 %vm245_vm1, %v230_v3 }
 0x192   : > { %v461_v5 = vpop.f32.mrb[0].mxu0 }
 0x193   : > { %v328_v6 = vadd.f32 %v461_v5, %v444_v4  ;;  %v322_v7 = vpop.f32.mrb[1].mxu0 }
 0x194   : > { %v323_v8 = vadd.f32 %v444_v4, %v322_v7 }
 0x195   : > { %333 = vst.msk [vmem:[%s202_s24 + $0x8] sm:$0xff] %vm331_vm2, %v328_v6 }
 0x196   : > { %332 = vst.msk [vmem:[%s202_s24] sm:$0xff] %vm331_vm2, %v323_v8 }
 0x197   : > { %570 = shalt.err (!%p567_p6)
}
 0x198   : > { %s571_s18 = scalar_lea.hbm %s797_s29, 256  ;;  %s575_s9 = scalar_lea.hbm %s849_s3, 512 }
 0x199   : > { %p572_p4 = scmp.ne.s32.totalorder %s797_s29, %s571_s18  ;;  %p576_p1 = scmp.lt.u32.totalorder %s797_s29, %s849_s3 }
 0x19a   : > { %p577_p2 = scmp.lt.u32.totalorder %s575_s9, %s571_s18  ;;  %p579_p8 = scmp.lt.u32.totalorder %s571_s18, %s797_s29 }
 0x19b   : > { %p573_p10 = pnand %p572_p4, %p858_p9 }
 0x19c   : > { %p578_p5 = por %p577_p2, %p576_p1 }
 0x19d   : > { %p574_p12 = pneg %p573_p10 }
 0x19e   : > { %p580_p11 = por %p579_p8, %p578_p5 }
 0x1a0   : > { %p581_p0 = pnand %p580_p11, %p574_p12 }
 0x1a2   : > { %584 = shalt.err (!%p581_p0)
}
 0x1a3   : > { %s643_s21 = smov 128   ;;  %s644_s22 = smov 8  }
 0x1a4   : > { %464 = dma.vmem_to_hbm [thread:$0]  (%p858_p9), %s792_s10, 256, %s797_s29, %s335_s30, %s643_s21, %s643_s21, %s644_s22  }
 0x1a5 PF: > { %s365_s23 = sand.u32 1, %s619_s12   ;;  %p859_p7 = scmp.ne.s32.totalorder %s854_s27, 0 }
 0x1a6   : > { %p860_p13 = scmp.ge.s32.totalorder %s639_s17, 2  ;;  %s366_s28 = scalar_lea.sflag [#allocation4], %s365_s23 }
 0x1a8   : > { %p471_p3 = pnand %p860_p13, %p859_p7 }
 0x1aa   : > { %614 = dma.done.wait (!%p471_p3), %s366_s28, 256  }
 0x1ab   : > { %616 = vsyncadd (!%p471_p3), %s366_s28, 4294967040  ;;  %s19_s17 = sadd.s32 1, %s639_s17   ;;  %s861_s12 = smov %s623_s13 }
 0x1ac   : > { %p16_p6 = scmp.ge.s32.totalorder %s19_s17, 4   ;;  %s862_s13 = smov %s627_s14 }
 0x1ad   : > { %s863_s14 = smov %s721_s26  ;;  %s864_s15 = smov %s635_s16 }
 0x1ae   : > { %s865_s16 = smov %s867_s20  ;;  %18 = sbr.rel (!%p16_p6) target bundleno = 6 (0x6), region = 77 }
 0x1b5   :  { %371 = vsyncpa [#allocation3], 1 }
 0x1b6   :  { %373 = vsyncpa [#allocation3 + $0x1], 1 }
 0x1b7   :  { %374 = vsyncpa [#allocation4], 1 }
 0x1b8   :  { %376 = vsyncpa [#allocation4 + $0x1], 1 }

</bundles_post_ra>
